<compile_context>
chip_gen: v7x
topology: tpu7x:2x2x1
jax: 0.10.0
libtpu: 0.0.40
codegen_flags: <defaults>
</compile_context>

<pallas_src>
import functools
import math

import jax
import jax.numpy as jnp
from jax.experimental import pallas as pl
from jax.experimental.pallas import tpu as pltpu


def _round_up(v: int, m: int) -> int:
    return (v + m - 1) // m * m


# --------------------------------------------------------------------------
# Kernel: one FCLayer (post-BN-folding) on a (tile_n, C_in_pad) batch tile.
# --------------------------------------------------------------------------
def _fc_layer_kernel(x_ref, w_ref, b_ref, bits_ref, o_ref, *,
                     keep_threshold: int, keep_scale: float,
                     add_residual: bool):
    x = x_ref[...]                                           # (tile_n, c_in) f32

    # MXU matmul on bf16 operands, f32 accumulation.
    z = jnp.dot(x.astype(jnp.bfloat16), w_ref[...],
                preferred_element_type=jnp.float32)          # (tile_n, c_out)

    # Folded bias + ReLU.
    z = jnp.maximum(z + b_ref[...], 0.0)

    # Inverted dropout: keep iff bits >= p * 2^32, scale survivors by 1/(1-p).
    if keep_threshold > 0:
        keep = bits_ref[...] >= jnp.uint32(keep_threshold)
        z = jnp.where(keep, z * jnp.float32(keep_scale), 0.0)

    # Fused residual add (FCNN: x_{k+1} = layer(x_k) + x_k for l2, l3).
    if add_residual:
        z = z + x

    o_ref[...] = z.astype(o_ref.dtype)


# --------------------------------------------------------------------------
# One FCLayer forward: BN-stats + folding in plain XLA, fused kernel for the
# row-independent part, tiled over the batch.
# --------------------------------------------------------------------------
def fc_layer_forward(x, gamma, beta, w_t, b, key, *, dropout_p,
                     add_residual=False, tile_n=256, eps=1e-5):
    """x: (N, C_in_pad) f32 (real batch rows, feature dim already 128-padded).
    gamma/beta: (C_in_pad,); w_t: (C_in_pad, C_out_pad) pre-transposed Linear
    weight (zero in padded rows/cols); b: (C_out_pad,).  Returns (N, C_out_pad)."""
    n, c_in = x.shape
    c_out = w_t.shape[1]
    if add_residual:
        assert c_in == c_out, "residual add requires matching feature dims"

    # --- BatchNorm1d training-mode batch statistics (full real batch),
    #     folded into the Linear weight/bias (one-pass E[x^2]-mean^2). ---
    mean = jnp.mean(x, axis=0)
    var = jnp.maximum(jnp.mean(jnp.square(x), axis=0) - jnp.square(mean), 0.0)
    scale = gamma * jax.lax.rsqrt(var + eps)
    shift = beta - mean * scale
    w_fold = (w_t * scale[:, None]).astype(jnp.bfloat16)        # MXU operand
    b_fold = (b + shift @ w_t).reshape(1, c_out).astype(jnp.float32)

    # --- batch (sublane) padding / tiling ---
    tile_n = min(tile_n, _round_up(n, 8))
    n_pad = _round_up(n, tile_n)
    x_p = x if n_pad == n else jnp.pad(x, ((0, n_pad - n), (0, 0)))

    # --- dropout random bits: one uint32 per output element, unique per tile ---
    p = float(dropout_p)
    keep_threshold = min(int(round(p * 2.0 ** 32)), 2 ** 32 - 1) if p > 0.0 else 0
    keep_scale = 1.0 / (1.0 - p) if p < 1.0 else 0.0
    bits = jax.random.bits(key, (n_pad, c_out), dtype=jnp.uint32)

    kernel = functools.partial(_fc_layer_kernel,
                               keep_threshold=keep_threshold,
                               keep_scale=keep_scale,
                               add_residual=add_residual)

    # VMEM budget: double-buffered x / bits / out tiles + resident bf16 W + b.
    vmem_need = (2 * tile_n * c_in * 4        # x tiles (f32)
                 + 2 * tile_n * c_out * 4     # bits tiles (u32)
                 + 2 * tile_n * c_out * 4     # out tiles (f32)
                 + 2 * c_in * c_out * 2       # weight (bf16)
                 + 2 * c_out * 4)             # bias
    vmem_limit = int(min(100 * 2 ** 20, max(8 * 2 ** 20, 2 * vmem_need)))

    out = pl.pallas_call(
        kernel,
        out_shape=jax.ShapeDtypeStruct((n_pad, c_out), jnp.float32),
        grid=(n_pad // tile_n,),
        in_specs=[
            pl.BlockSpec((tile_n, c_in), lambda i: (i, 0)),    # x tile (streamed)
            pl.BlockSpec((c_in, c_out), lambda i: (0, 0)),     # folded W (resident)
            pl.BlockSpec((1, c_out), lambda i: (0, 0)),        # folded bias
            pl.BlockSpec((tile_n, c_out), lambda i: (i, 0)),   # dropout bits
        ],
        out_specs=pl.BlockSpec((tile_n, c_out), lambda i: (i, 0)),
        compiler_params=pltpu.CompilerParams(
            dimension_semantics=("parallel",),
            vmem_limit_bytes=vmem_limit),
    )(x_p, w_fold, b_fold, bits)
    return out[:n]


# --------------------------------------------------------------------------
# FCNN parameters (torch-style init) with feature dims padded to 128 lanes.
# --------------------------------------------------------------------------
def init_fcnn_params(key, inputs, hidden, outputs):
    dims = [(inputs, hidden), (hidden, hidden), (hidden, hidden), (hidden, outputs)]
    params = []
    for c_in, c_out in dims:
        key, kw, kb = jax.random.split(key, 3)
        bound = 1.0 / math.sqrt(c_in)
        w = jax.random.uniform(kw, (c_out, c_in), jnp.float32, -bound, bound)
        b = jax.random.uniform(kb, (c_out,), jnp.float32, -bound, bound)
        gamma = jnp.ones((c_in,), jnp.float32)   # torch BatchNorm1d defaults
        beta = jnp.zeros((c_in,), jnp.float32)

        ci_p, co_p = _round_up(c_in, 128), _round_up(c_out, 128)
        params.append(dict(
            gamma=jnp.pad(gamma, (0, ci_p - c_in)),
            beta=jnp.pad(beta, (0, ci_p - c_in)),
            w_t=jnp.zeros((ci_p, co_p), jnp.float32).at[:c_in, :c_out].set(w.T),
            b=jnp.pad(b, (0, co_p - c_out)),
        ))
    return params


def fcnn_forward(x, params, key, *, dropout_p):
    """x: (N, inputs) f32. Returns (N, outputs_pad) f32 (padded cols are zero)."""
    n, c_in = x.shape
    c_in_pad = params[0]["w_t"].shape[0]
    x_p = jnp.pad(x, ((0, 0), (0, c_in_pad - c_in)))
    k1, k2, k3, k4 = jax.random.split(key, 4)

    h1 = fc_layer_forward(x_p, **params[0], key=k1, dropout_p=dropout_p)
    h2 = fc_layer_forward(h1, **params[1], key=k2, dropout_p=dropout_p,
                          add_residual=True)                   # l2(h1) + h1
    h3 = fc_layer_forward(h2, **params[2], key=k3, dropout_p=dropout_p,
                          add_residual=True)                   # l3(h2) + h2
    h4 = fc_layer_forward(h3, **params[3], key=k4, dropout_p=dropout_p)
    return h4


if __name__ == "__main__":
    # FCNN(inputs=32, outputs=16, hidden_size=64, dropout_p=0.5), batch=8.
    INPUTS, HIDDEN, OUTPUTS = 32, 64, 16
    N, DROPOUT_P = 8, 0.5

    root = jax.random.PRNGKey(0)
    k_params, k_x, k_drop = jax.random.split(root, 3)

    params = init_fcnn_params(k_params, INPUTS, HIDDEN, OUTPUTS)
    x = jax.random.normal(k_x, (N, INPUTS), dtype=jnp.float32)

    out_pad = fcnn_forward(x, params, k_drop, dropout_p=DROPOUT_P)
    out = out_pad[:, :OUTPUTS]
    jax.block_until_ready(out)

    assert out.shape == (N, OUTPUTS)
    assert bool(jnp.all(jnp.isfinite(out)))
    print("KERNEL_OK")
</pallas_src>

<mosaic_0001>
module attributes {stable_mosaic.version = 11 : i64} {
  func.func @_fc_layer_kernel(%arg0: i32, %arg1: memref<8x128xf32, #tpu.memory_space<vmem>>, %arg2: memref<128x128xbf16, #tpu.memory_space<vmem>>, %arg3: memref<1x128xf32, #tpu.memory_space<vmem>>, %arg4: memref<8x128xi32, #tpu.memory_space<vmem>>, %arg5: memref<8x128xf32, #tpu.memory_space<vmem>>) attributes {dimension_semantics = [#tpu.dimension_semantics<parallel>], iteration_bounds = array<i64: 1>, scalar_prefetch = 0 : i64, scratch_operands = 0 : i64, tpu.core_type = #tpu.core_type<tc>, window_params = [{transform_indices = @transform_0, window_bounds = array<i64: 8, 128>}, {pipeline_mode = #tpu.pipeline_mode<synchronous>, transform_indices = @transform_1, window_bounds = array<i64: 128, 128>}, {pipeline_mode = #tpu.pipeline_mode<synchronous>, transform_indices = @transform_2, window_bounds = array<i64: 1, 128>}, {transform_indices = @transform_3, window_bounds = array<i64: 8, 128>}, {transform_indices = @transform_4, window_bounds = array<i64: 8, 128>}]} {
    %c0 = arith.constant 0 : index
    %c0_0 = arith.constant 0 : index
    %0 = vector.load %arg1[%c0, %c0_0] : memref<8x128xf32, #tpu.memory_space<vmem>>, vector<8x128xf32>
    %1 = arith.truncf %0 : vector<8x128xf32> to vector<8x128xbf16>
    %c0_1 = arith.constant 0 : index
    %c0_2 = arith.constant 0 : index
    %2 = vector.load %arg2[%c0_1, %c0_2] : memref<128x128xbf16, #tpu.memory_space<vmem>>, vector<128x128xbf16>
    %cst = arith.constant dense<0.000000e+00> : vector<8x128xf32>
    %3 = tpu.matmul %1, %2, %cst {dimension_numbers = #tpu.dot_dimension_numbers<[1], [0], [0], [1], [0, 0, 1, 1], [], []>} : vector<8x128xbf16>, vector<128x128xbf16>, vector<8x128xf32> -> vector<8x128xf32>
    %c0_3 = arith.constant 0 : index
    %c0_4 = arith.constant 0 : index
    %4 = vector.load %arg3[%c0_3, %c0_4] : memref<1x128xf32, #tpu.memory_space<vmem>>, vector<1x128xf32>
    %5 = vector.broadcast %4 : vector<1x128xf32> to vector<8x128xf32>
    %6 = arith.addf %3, %5 : vector<8x128xf32>
    %cst_5 = arith.constant 0.000000e+00 : f32
    %7 = vector.broadcast %cst_5 : f32 to vector<8x128xf32>
    %8 = arith.maximumf %6, %7 : vector<8x128xf32>
    %c0_6 = arith.constant 0 : index
    %c0_7 = arith.constant 0 : index
    %9 = vector.load %arg4[%c0_6, %c0_7] : memref<8x128xi32, #tpu.memory_space<vmem>>, vector<8x128xi32>
    %c-2147483648_i32 = arith.constant -2147483648 : i32
    %10 = vector.broadcast %c-2147483648_i32 : i32 to vector<8x128xi32>
    %11 = arith.cmpi uge, %9, %10 : vector<8x128xi32>
    %cst_8 = arith.constant 2.000000e+00 : f32
    %12 = vector.broadcast %cst_8 : f32 to vector<8x128xf32>
    %13 = arith.mulf %8, %12 : vector<8x128xf32>
    %cst_9 = arith.constant 0.000000e+00 : f32
    %14 = vector.broadcast %cst_9 : f32 to vector<8x128xf32>
    %15 = arith.select %11, %13, %14 : vector<8x128xi1>, vector<8x128xf32>
    %c0_10 = arith.constant 0 : index
    %c0_11 = arith.constant 0 : index
    %16 = vector.load %arg5[%c0_10, %c0_11] : memref<8x128xf32, #tpu.memory_space<vmem>>, vector<8x128xf32>
    tpu.vector_store %arg5[%c0_10, %c0_11], %15 {strides = array<i32>} : memref<8x128xf32, #tpu.memory_space<vmem>>, vector<8x128xf32>,
    return
  }
  func.func @transform_0(%arg0: i32) -> (i32, i32) {
    %c0_i32 = arith.constant 0 : i32
    %c0_i32_0 = arith.constant 0 : i32
    return %arg0, %c0_i32 : i32, i32
  }
  func.func @transform_1(%arg0: i32) -> (i32, i32) {
    %c0_i32 = arith.constant 0 : i32
    %c0_i32_0 = arith.constant 0 : i32
    %c0_i32_1 = arith.constant 0 : i32
    return %c0_i32, %c0_i32_0 : i32, i32
  }
  func.func @transform_2(%arg0: i32) -> (i32, i32) {
    %c0_i32 = arith.constant 0 : i32
    %c0_i32_0 = arith.constant 0 : i32
    %c0_i32_1 = arith.constant 0 : i32
    return %c0_i32, %c0_i32_0 : i32, i32
  }
  func.func @transform_3(%arg0: i32) -> (i32, i32) {
    %c0_i32 = arith.constant 0 : i32
    %c0_i32_0 = arith.constant 0 : i32
    return %arg0, %c0_i32 : i32, i32
  }
  func.func @transform_4(%arg0: i32) -> (i32, i32) {
    %c0_i32 = arith.constant 0 : i32
    %c0_i32_0 = arith.constant 0 : i32
    return %arg0, %c0_i32 : i32, i32
  }
}

</mosaic_0001>

<bundles_post_ra>
// kernel: tpu_custom_call.1
= control target key start
LH: loop header
LB: loop body
LE: loop exit
PB: predicated region body
PF: predicated region fallthrough
CT: control target
= control target key end

     0   :  { %9 = vsyncpa [#allocation3], 0  ;;  %s386_s0 = inlined_call_operand.hbm [shape: f32[8,128], index: 0, kind: input, shape index: {}]   ;;  %s387_s1 = inlined_call_operand.hbm [shape: bf16[128,128], index: 1, kind: input, shape index: {}]   ;;  %s388_s2 = inlined_call_operand.vmem [shape: f32[1,128], index: 2, kind: input, shape index: {}]   ;;  %s389_s3 = inlined_call_operand.vmem [shape: u32[8,128], index: 3, kind: input, shape index: {}]   ;;  %s390_s4 = inlined_call_operand.hbm [shape: f32[8,128], index: 4, kind: output, shape index: {}]  }
   0x1   :  { %10 = vsyncpa [#allocation6], 0 }
   0x2   :  { %11 = vsyncpa [#allocation4], 0  ;;  %s305_s15 = smov [#allocation2]   ;;  %s306_s17 = smov [#allocation5]  }
   0x3   :  { %s18_s16 = sshll.u32 %s305_s15, 4  ;;  %s27_s18 = sshll.u32 %s306_s17, 4  ;;  %s19_s16 = int_to_ptr.vmem [resolvable:$true] %s18_s16  ;;  %s337_s18 = int_to_ptr.vmem [resolvable:$true] %s27_s18 }
   0x4   :  { %s233_s21 = scalar_lea.hbm %s386_s0, 128 }
   0x5   :  { %p234_p0 = scmp.ne.s32.totalorder %s386_s0, %s233_s21  ;;  %p237_p1 = scmp.lt.u32.totalorder %s233_s21, %s386_s0 }
   0x7   :  { %p239_p2 = pnand %p237_p1, %p234_p0 }
   0x9   :  { %242 = shalt.err (!%p239_p2)
}
   0xa   :  { %s243_s26 = scalar_lea.vmem %s19_s16, 128  ;;  %p248_p4 = scmp.lt.s32.totalorder %s19_s16, %s19_s16 }
   0xb   :  { %p244_p3 = scmp.ne.s32.totalorder %s19_s16, %s243_s26  ;;  %p249_p5 = scmp.lt.s32.totalorder %s243_s26, %s243_s26 }
   0xd   :  { %p250_p6 = por %p249_p5, %p248_p4 }
   0xf   :  { %p251_p7 = pnand %p250_p6, %p244_p3 }
  0x11   :  { %254 = shalt.err (!%p251_p7)
}
  0x12   :  { %21 = dma.hbm_to_vmem [thread:$0]  %s386_s0, 128, %s19_s16, [#allocation3]  }
  0x13   :  { %s255_s5 = scalar_lea.hbm %s387_s1, 1024 }
  0x14   :  { %p256_p8 = scmp.ne.s32.totalorder %s387_s1, %s255_s5  ;;  %p259_p9 = scmp.lt.u32.totalorder %s255_s5, %s387_s1 }
  0x16   :  { %p261_p10 = pnand %p259_p9, %p256_p8 }
  0x18   :  { %264 = shalt.err (!%p261_p10)
}
  0x19   :  { %s265_s10 = scalar_lea.vmem %s337_s18, 1024  ;;  %p270_p12 = scmp.lt.s32.totalorder %s337_s18, %s337_s18 }
  0x1a   :  { %p266_p11 = scmp.ne.s32.totalorder %s337_s18, %s265_s10  ;;  %p271_p13 = scmp.lt.s32.totalorder %s265_s10, %s265_s10 }
  0x1c   :  { %p272_p0 = por %p271_p13, %p270_p12 }
  0x1e   :  { %p273_p1 = pnand %p272_p0, %p266_p11 }
  0x20   :  { %276 = shalt.err (!%p273_p1)
}
  0x21   :  { %s307_s0 = smov 64   ;;  %s308_s11 = smov 4  }
  0x22   :  { %33 = dma.hbm_to_vmem [thread:$0]  %s387_s1, 1024, %s337_s18, [#allocation6], %s307_s0, %s307_s0, %s308_s11  }
  0x23   :  { %299 = dma.done.wait [#allocation3], 128  }
  0x24   :  { %300 = vsyncadd [#allocation3], 4294967168 }
  0x25   :  { %301 = dma.done.wait [#allocation6], 1024  }
  0x26   :  { %302 = vsyncadd [#allocation6], 4294966272  ;;  %v309_v0 = vmov 0.0   ;;  %vm310_vm0 = vmmov 0   ;;  %v225_v1 = vld [vmem:[#allocation5] sm:$0xff]   ;;  %v226_v2 = vld [vmem:[#allocation5 + $0x8] sm:$0xff]  }
  0x27   :  { %198 = vmatprep.subr.bf16.mxu0 %v309_v0  ;;  %214 = vmatprep.mubr.msk.bf16.mxu0 %vm310_vm0, %v309_v0  ;;  %v227_v3 = vld [vmem:[#allocation5 + $0x10] sm:$0xff]   ;;  %v228_v4 = vld [vmem:[#allocation5 + $0x18] sm:$0xff]   ;;  %v229_v5 = vld [vmem:[#allocation5 + $0x20] sm:$0xff]   ;;  %s311_s17 = smov [#allocation7]  }
  0x28   :  { %199 = vmatpush3.bf16.msra.mxu0 %v225_v1  ;;  %v230_v6 = vld [vmem:[#allocation5 + $0x28] sm:$0xff]   ;;  %v231_v7 = vld [vmem:[#allocation5 + $0x30] sm:$0xff]   ;;  %v232_v8 = vld [vmem:[#allocation5 + $0x38] sm:$0xff]   ;;  %s170_s18 = sshll.u32 %s311_s17, 4  ;;  %s171_s18 = int_to_ptr.vmem [resolvable:$true] %s170_s18 }
  0x29   :  { %200 = vmatprep.subr.bf16.mxu0 %v309_v0  ;;  %v45_v9 = vld [vmem:[#allocation2] sm:$0xff]  ;;  %s277_s19 = scalar_lea.vmem %s171_s18, 128  ;;  %p282_p3 = scmp.lt.s32.totalorder %s171_s18, %s171_s18 }
  0x2a   :  { %v46_v10 = vpack.c.bf16 %v45_v9, %v45_v9  ;;  %v180_v11 = vld [vmem:[%s388_s2] ss:$0 sm:$0xff]  ;;  %p278_p2 = scmp.ne.s32.totalorder %s171_s18, %s277_s19  ;;  %p283_p4 = scmp.lt.s32.totalorder %s277_s19, %s277_s19 }
  0x2b   :  { %v159_v15 = vld [vmem:[%s389_s3] sm:$0xff] }
  0x2c   :  { %201 = vmatpush3.bf16.msra.mxu0 %v226_v2  ;;  %vm160_vm1 = vcmp.ge.u32.totalorder %v159_v15, 2147483648  ;;  %p284_p5 = por %p283_p4, %p282_p3 }
  0x2d   :  { %202 = vmatprep.subr.bf16.mxu0 %v309_v0 }
  0x2e   :  { %p285_p6 = pnand %p284_p5, %p278_p2 }
  0x30   :  { %203 = vmatpush3.bf16.msra.mxu0 %v227_v3 }
  0x31   :  { %204 = vmatprep.subr.bf16.mxu0 %v309_v0 }
  0x34   :  { %205 = vmatpush3.bf16.msra.mxu0 %v228_v4 }
  0x35   :  { %206 = vmatprep.subr.bf16.mxu0 %v309_v0 }
  0x38   :  { %207 = vmatpush3.bf16.msra.mxu0 %v229_v5 }
  0x39   :  { %208 = vmatprep.subr.bf16.mxu0 %v309_v0 }
  0x3c   :  { %209 = vmatpush3.bf16.msra.mxu0 %v230_v6 }
  0x3d   :  { %210 = vmatprep.subr.bf16.mxu0 %v309_v0 }
  0x40   :  { %211 = vmatpush3.bf16.msra.mxu0 %v231_v7 }
  0x41   :  { %212 = vmatprep.subr.bf16.mxu0 %v309_v0 }
  0x44   :  { %213 = vmatpush3.bf16.msra.mxu0 %v232_v8 }
  0x47   :  { %215 = vmatmul.mubr.bf16.vlgmr.msra.gmra.mrb[0].mxu0 %v46_v10 }
 0x11a   :  { %v152_v12 = vpop.f32.mrb[0].mxu0 }
 0x11b   :  { %v153_v13 = vadd.f32 %v180_v11, %v152_v12  ;;  %v216_v14 = vpop.f32.mrb[1].mxu0 }
 0x11c   :  { %v155_v16 = vpop.f32.mrb[2].mxu0 }
 0x11d   :  { %v158_v17 = vmax.f32 %v153_v13, 0.0  ;;  %v217_v18 = vpop.f32.mrb[3].mxu0 }
 0x11f   :  { %v161_v19 = vmul.f32 2.0, %v158_v17 }
 0x121   :  { %v162_v20 = vsel %vm160_vm1, %v161_v19, 0.0 }
 0x122   :  { %163 = vst [vmem:[#allocation7] sm:$0xff] %v162_v20 }
 0x123   :  { %288 = shalt.err (!%p285_p6)
}
 0x124   :  { %s289_s3 = scalar_lea.hbm %s390_s4, 128 }
 0x125   :  { %p290_p7 = scmp.ne.s32.totalorder %s390_s4, %s289_s3  ;;  %p293_p8 = scmp.lt.u32.totalorder %s289_s3, %s390_s4 }
 0x127   :  { %p295_p9 = pnand %p293_p8, %p290_p7 }
 0x129   :  { %298 = shalt.err (!%p295_p9)
}
 0x12a   :  { %173 = dma.vmem_to_hbm [thread:$0]  %s171_s18, 128, %s390_s4, [#allocation4]  }
 0x12b   :  { %303 = dma.done.wait [#allocation4], 128  }
 0x12c   :  { %304 = vsyncadd [#allocation4], 4294967168 }
 0x12d   :  { %177 = vsyncpa [#allocation3], 1 }
 0x12e   :  { %178 = vsyncpa [#allocation6], 1 }
 0x12f   :  { %179 = vsyncpa [#allocation4], 1 }

</bundles_post_ra>
